<compile_context>
chip_gen: v5e
topology: v5e:2x2
jax: 0.10.0
libtpu: 0.0.40
codegen_flags: <defaults>
</compile_context>

<pallas_src>
import math
from functools import partial

import jax
import jax.numpy as jnp
from jax.experimental import pallas as pl
from jax.experimental.pallas import tpu as pltpu


# ----------------------------- Pallas kernel --------------------------------

def _layernorm_f32(x, gamma, beta, eps=1e-6):
    mu = jnp.mean(x, axis=-1, keepdims=True)
    var = jnp.mean((x - mu) ** 2, axis=-1, keepdims=True)
    return (x - mu) * jax.lax.rsqrt(var + eps) * gamma + beta


def encoder_stack_kernel(H, dk, compute_dtype,
                         x_ref, wqkv_ref, bqkv_ref, wo_ref, bo_ref,
                         g1_ref, beta1_ref, w1_ref, b1_ref, w2_ref, b2_ref,
                         g2_ref, beta2_ref, out_ref):
    """One encoder layer per grid step.  The layer grid axis is innermost and
    'arbitrary': the activation lives in the revisited output VMEM block across
    layers, so intermediate activations never touch HBM."""
    layer = pl.program_id(1)
    HD = H * dk

    # Layer 0: seed the resident activation block with the kernel input.
    @pl.when(layer == 0)
    def _():
        out_ref[...] = x_ref[...]

    x = out_ref[...]                                   # (S, D) f32 activation
    xm = x.astype(compute_dtype)

    # ---- fused Q/K/V projection: one full-width (S,D)x(D,3*H*dk) matmul ----
    # 1/sqrt(dk) has been folded into the Q weight/bias columns in the wrapper.
    qkv = jnp.dot(xm, wqkv_ref[0], preferred_element_type=jnp.float32) + bqkv_ref[0]
    qkv_c = qkv.astype(compute_dtype)

    # ---- scaled dot-product attention, unrolled over heads on 2-D tiles ----
    # (softmax statistics stay in f32; no 3-D stacks / relayouts)
    head_outs = []
    for h in range(H):
        qh = qkv_c[:, h * dk:(h + 1) * dk]                       # (S, dk)
        kh = qkv_c[:, HD + h * dk:HD + (h + 1) * dk]             # (S, dk)
        vh = qkv_c[:, 2 * HD + h * dk:2 * HD + (h + 1) * dk]     # (S, dk)
        s = jnp.dot(qh, kh.T, preferred_element_type=jnp.float32)  # (S, S)
        s = s - jnp.max(s, axis=-1, keepdims=True)
        p = jnp.exp(s)
        # exact reciprocal keeps the 1e-4 check; approx=True is the EUP fast path.
        p = p * pl.reciprocal(jnp.sum(p, axis=-1, keepdims=True), approx=False)
        head_outs.append(jnp.dot(p.astype(compute_dtype), vh,
                                 preferred_element_type=jnp.float32))  # (S, dk)
    heads2d = jnp.concatenate(head_outs, axis=1)                 # (S, H*dk)

    # ---- single output projection matmul (concat-heads -> D) ----
    attn = jnp.dot(heads2d.astype(compute_dtype), wo_ref[0],
                   preferred_element_type=jnp.float32) + bo_ref[0]

    # ---- residual + LayerNorm (f32) ----
    y = _layernorm_f32(x + attn, g1_ref[0], beta1_ref[0])

    # ---- feed forward: Linear -> ReLU -> Linear ----
    h1 = jnp.dot(y.astype(compute_dtype), w1_ref[0],
                 preferred_element_type=jnp.float32) + b1_ref[0]
    h1 = jnp.maximum(h1, 0.0)
    ff = jnp.dot(h1.astype(compute_dtype), w2_ref[0],
                 preferred_element_type=jnp.float32) + b2_ref[0]

    # ---- residual + LayerNorm (f32), store resident activation ----
    out_ref[...] = _layernorm_f32(y + ff, g2_ref[0], beta2_ref[0]).astype(out_ref.dtype)


# --------------------------- wrapper / pallas_call ---------------------------

def prepare_params(layer_params, compute_dtype=jnp.float32):
    """Fuse per-head projections into full-width matrices, fold 1/sqrt(dk) into
    Q, and stack all layers along a leading axis for weight streaming."""
    def fuse(p):
        H, D, dk = p['wq'].shape
        inv = 1.0 / math.sqrt(float(dk))
        to2d = lambda w: jnp.transpose(w, (1, 0, 2)).reshape(D, H * dk)   # (D, H*dk)
        wqkv = jnp.concatenate([to2d(p['wq']) * inv, to2d(p['wk']), to2d(p['wv'])], axis=1)
        bqkv = jnp.concatenate([p['bq'].reshape(1, H * dk) * inv,
                                p['bk'].reshape(1, H * dk),
                                p['bv'].reshape(1, H * dk)], axis=1)
        return {
            'wqkv': wqkv.astype(compute_dtype),                 # (D, 3*H*dk)
            'bqkv': bqkv.astype(jnp.float32),                   # (1, 3*H*dk)
            'wo':   p['wo'].reshape(H * dk, D).astype(compute_dtype),
            'bo':   p['bo'].astype(jnp.float32),
            'g1':   p['g1'], 'beta1': p['beta1'],
            'w1':   p['w1'].astype(compute_dtype), 'b1': p['b1'],
            'w2':   p['w2'].astype(compute_dtype), 'b2': p['b2'],
            'g2':   p['g2'], 'beta2': p['beta2'],
        }
    fused = [fuse(p) for p in layer_params]
    return {k: jnp.stack([f[k] for f in fused], axis=0) for k in fused[0]}


def transformer_encoder(x, stacked, *, num_heads, compute_dtype=jnp.float32):
    """x: (B, S, D) float32.  stacked: output of prepare_params."""
    B, S, D = x.shape
    L, _, threeHD = stacked['wqkv'].shape
    HD = threeHD // 3
    dk = HD // num_heads
    F = stacked['w1'].shape[2]

    x2 = x.reshape(B * S, D).astype(jnp.float32)     # 2-D activation slab

    weight_names = ('wqkv', 'bqkv', 'wo', 'bo', 'g1', 'beta1',
                    'w1', 'b1', 'w2', 'b2', 'g2', 'beta2')
    weights = [stacked[n] for n in weight_names]

    def weight_spec(shape):
        nd = len(shape)
        return pl.BlockSpec((1,) + tuple(shape[1:]),
                            lambda b, l, _nd=nd: (l,) + (0,) * (_nd - 1))

    in_specs = [pl.BlockSpec((S, D), lambda b, l: (b, 0))]
    in_specs += [weight_spec(w.shape) for w in weights]
    out_spec = pl.BlockSpec((S, D), lambda b, l: (b, 0))

    # VMEM budget: double-buffered per-layer weights + activation blocks + slack,
    # clamped so it is valid on v7x (64 MiB physical VMEM per TensorCore).
    per_layer_weight_bytes = sum((int(w.size) // L) * w.dtype.itemsize for w in weights)
    act_bytes = S * D * 4
    vmem_limit = int(min(max(4 * per_layer_weight_bytes + 8 * act_bytes + (4 << 20),
                             16 << 20),
                         60 << 20))

    flops = 2 * B * S * L * (D * threeHD + HD * D + 2 * D * F + 2 * S * HD)
    weight_bytes = sum(int(w.size) * w.dtype.itemsize for w in weights)
    cost = pl.CostEstimate(
        flops=int(flops),
        transcendentals=int(B * L * num_heads * S * S),
        bytes_accessed=int(2 * x2.size * 4 + B * weight_bytes),
    )

    out2 = pl.pallas_call(
        partial(encoder_stack_kernel, num_heads, dk, compute_dtype),
        out_shape=jax.ShapeDtypeStruct((B * S, D), jnp.float32),
        grid_spec=pltpu.PrefetchScalarGridSpec(
            num_scalar_prefetch=0,
            grid=(B, L),                         # (batch, layer)
            in_specs=in_specs,
            out_specs=out_spec,
        ),
        compiler_params=pltpu.CompilerParams(
            dimension_semantics=("parallel", "arbitrary"),
            vmem_limit_bytes=vmem_limit,
        ),
        cost_estimate=cost,
    )(x2, *weights)
    return out2.reshape(B, S, D)


# ------------------------- parameter initialization -------------------------

def init_layer_params(key, D, H, F):
    """Deterministic synthetic weights, PyTorch-like per-head layout (in, out)."""
    dk = D // H
    ks = jax.random.split(key, 12)
    s = 0.05
    return {
        'wq': jax.random.normal(ks[0], (H, D, dk), jnp.float32) * s,
        'bq': jax.random.normal(ks[1], (H, dk), jnp.float32) * s,
        'wk': jax.random.normal(ks[2], (H, D, dk), jnp.float32) * s,
        'bk': jax.random.normal(ks[3], (H, dk), jnp.float32) * s,
        'wv': jax.random.normal(ks[4], (H, D, dk), jnp.float32) * s,
        'bv': jax.random.normal(ks[5], (H, dk), jnp.float32) * s,
        'wo': jax.random.normal(ks[6], (H, dk, D), jnp.float32) * s,   # concat(H*dv)->D
        'bo': jax.random.normal(ks[7], (1, D), jnp.float32) * s,
        'g1': jnp.ones((1, D), jnp.float32),
        'beta1': jnp.zeros((1, D), jnp.float32),
        'w1': jax.random.normal(ks[8], (D, F), jnp.float32) * s,
        'b1': jax.random.normal(ks[9], (1, F), jnp.float32) * s,
        'w2': jax.random.normal(ks[10], (F, D), jnp.float32) * s,
        'b2': jax.random.normal(ks[11], (1, D), jnp.float32) * s,
        'g2': jnp.ones((1, D), jnp.float32),
        'beta2': jnp.zeros((1, D), jnp.float32),
    }


# --------------------------- pure-JAX reference ------------------------------

def _layernorm_ref(x, g, b, eps=1e-6):
    mu = x.mean(-1, keepdims=True)
    var = ((x - mu) ** 2).mean(-1, keepdims=True)
    return (x - mu) / jnp.sqrt(var + eps) * g + b


def reference_layer(x, p):
    dk = p['wq'].shape[2]
    q = jnp.einsum('bsd,hdk->bhsk', x, p['wq']) + p['bq'][None, :, None, :]
    k = jnp.einsum('bsd,hdk->bhsk', x, p['wk']) + p['bk'][None, :, None, :]
    v = jnp.einsum('bsd,hdk->bhsk', x, p['wv']) + p['bv'][None, :, None, :]
    scores = jnp.einsum('bhsk,bhtk->bhst', q, k) / math.sqrt(dk)
    attnw = jax.nn.softmax(scores, axis=-1)
    heads = jnp.einsum('bhst,bhtv->bhsv', attnw, v)
    attn = jnp.einsum('bhsv,hvd->bsd', heads, p['wo']) + p['bo'][0]
    y = _layernorm_ref(x + attn, p['g1'][0], p['beta1'][0])
    h1 = jax.nn.relu(y @ p['w1'] + p['b1'][0])
    ff = h1 @ p['w2'] + p['b2'][0]
    return _layernorm_ref(y + ff, p['g2'][0], p['beta2'][0])


def reference_encoder(x, layer_params):
    for p in layer_params:
        x = reference_layer(x, p)
    return x


# ---------------------------------- main -------------------------------------

if __name__ == "__main__":
    # Small shapes consistent with the module: (batch, seq, dim_model)
    B, S, D = 2, 8, 32
    H, F = 4, 64          # num_heads, dim_feedforward
    NUM_LAYERS = 2

    key = jax.random.PRNGKey(0)
    kx, kp = jax.random.split(key)
    x = jax.random.normal(kx, (B, S, D), jnp.float32)

    layer_keys = jax.random.split(kp, NUM_LAYERS)
    layer_params = [init_layer_params(k, D, H, F) for k in layer_keys]

    # compute_dtype=jnp.bfloat16 is the recommended setting on v6e/v7x at real
    # model sizes; float32 here keeps the strict 1e-4 check vs the reference.
    stacked = prepare_params(layer_params, compute_dtype=jnp.float32)

    encoder = jax.jit(
        lambda inp, w: transformer_encoder(inp, w, num_heads=H,
                                           compute_dtype=jnp.float32))
    out = jax.block_until_ready(encoder(x, stacked))

    ref = reference_encoder(x, layer_params)
    assert out.shape == (B, S, D)
    assert jnp.allclose(out, ref, atol=1e-4, rtol=1e-4), "mismatch vs pure-JAX reference"

    # TODO(synk): pos_encoding exists in __init__ but is never applied in
    # TransformerEncoder.forward, so it is intentionally omitted.
    print("KERNEL_OK")
</pallas_src>

<mosaic_0001>
module attributes {stable_mosaic.version = 11 : i64} {
  func.func @encoder_stack_kernel(%arg0: i32, %arg1: i32, %arg2: memref<8x32xf32, #tpu.memory_space<vmem>>, %arg3: memref<1x32x96xf32, #tpu.memory_space<vmem>>, %arg4: memref<1x1x96xf32, #tpu.memory_space<vmem>>, %arg5: memref<1x32x32xf32, #tpu.memory_space<vmem>>, %arg6: memref<1x1x32xf32, #tpu.memory_space<vmem>>, %arg7: memref<1x1x32xf32, #tpu.memory_space<vmem>>, %arg8: memref<1x1x32xf32, #tpu.memory_space<vmem>>, %arg9: memref<1x32x64xf32, #tpu.memory_space<vmem>>, %arg10: memref<1x1x64xf32, #tpu.memory_space<vmem>>, %arg11: memref<1x64x32xf32, #tpu.memory_space<vmem>>, %arg12: memref<1x1x32xf32, #tpu.memory_space<vmem>>, %arg13: memref<1x1x32xf32, #tpu.memory_space<vmem>>, %arg14: memref<1x1x32xf32, #tpu.memory_space<vmem>>, %arg15: memref<8x32xf32, #tpu.memory_space<vmem>>) attributes {dimension_semantics = [#tpu.dimension_semantics<parallel>, #tpu.dimension_semantics<arbitrary>], iteration_bounds = array<i64: 2, 2>, scalar_prefetch = 0 : i64, scratch_operands = 0 : i64, tpu.core_type = #tpu.core_type<tc>, window_params = [{transform_indices = @transform_0, window_bounds = array<i64: 8, 32>}, {transform_indices = @transform_1, window_bounds = array<i64: 1, 32, 96>}, {transform_indices = @transform_2, window_bounds = array<i64: 1, 1, 96>}, {transform_indices = @transform_3, window_bounds = array<i64: 1, 32, 32>}, {transform_indices = @transform_4, window_bounds = array<i64: 1, 1, 32>}, {transform_indices = @transform_5, window_bounds = array<i64: 1, 1, 32>}, {transform_indices = @transform_6, window_bounds = array<i64: 1, 1, 32>}, {transform_indices = @transform_7, window_bounds = array<i64: 1, 32, 64>}, {transform_indices = @transform_8, window_bounds = array<i64: 1, 1, 64>}, {transform_indices = @transform_9, window_bounds = array<i64: 1, 64, 32>}, {transform_indices = @transform_10, window_bounds = array<i64: 1, 1, 32>}, {transform_indices = @transform_11, window_bounds = array<i64: 1, 1, 32>}, {transform_indices = @transform_12, window_bounds = array<i64: 1, 1, 32>}, {transform_indices = @transform_13, window_bounds = array<i64: 8, 32>}]} {
    %c0_i32 = arith.constant 0 : i32
    %0 = arith.cmpi eq, %arg1, %c0_i32 : i32
    %1 = arith.extui %0 : i1 to i32
    %c0_i32_0 = arith.constant 0 : i32
    %2 = arith.cmpi ne, %1, %c0_i32_0 : i32
    scf.if %2 {
      %c0_70 = arith.constant 0 : index
      %c0_71 = arith.constant 0 : index
      %154 = vector.load %arg2[%c0_70, %c0_71] : memref<8x32xf32, #tpu.memory_space<vmem>>, vector<8x32xf32>
      %c0_72 = arith.constant 0 : index
      %c0_73 = arith.constant 0 : index
      %155 = vector.load %arg15[%c0_72, %c0_73] : memref<8x32xf32, #tpu.memory_space<vmem>>, vector<8x32xf32>
      tpu.vector_store %arg15[%c0_72, %c0_73], %154 {strides = array<i32>} : memref<8x32xf32, #tpu.memory_space<vmem>>, vector<8x32xf32>,
    } else {
    }
    %c0 = arith.constant 0 : index
    %c0_1 = arith.constant 0 : index
    %3 = vector.load %arg15[%c0, %c0_1] : memref<8x32xf32, #tpu.memory_space<vmem>>, vector<8x32xf32>
    %c0_2 = arith.constant 0 : index
    %c0_3 = arith.constant 0 : index
    %c0_4 = arith.constant 0 : index
    %4 = vector.load %arg3[%c0_2, %c0_3, %c0_4] : memref<1x32x96xf32, #tpu.memory_space<vmem>>, vector<1x32x96xf32>
    %5 = vector.shape_cast %4 : vector<1x32x96xf32> to vector<32x96xf32>
    %cst = arith.constant dense<0.000000e+00> : vector<8x96xf32>
    %6 = tpu.matmul %3, %5, %cst {dimension_numbers = #tpu.dot_dimension_numbers<[1], [0], [0], [1], [0, 0, 1, 1], [], []>} : vector<8x32xf32>, vector<32x96xf32>, vector<8x96xf32> -> vector<8x96xf32>
    %c0_5 = arith.constant 0 : index
    %c0_6 = arith.constant 0 : index
    %c0_7 = arith.constant 0 : index
    %7 = vector.load %arg4[%c0_5, %c0_6, %c0_7] : memref<1x1x96xf32, #tpu.memory_space<vmem>>, vector<1x1x96xf32>
    %8 = vector.shape_cast %7 : vector<1x1x96xf32> to vector<1x96xf32>
    %9 = vector.broadcast %8 : vector<1x96xf32> to vector<8x96xf32>
    %10 = arith.addf %6, %9 : vector<8x96xf32>
    %11 = vector.extract_strided_slice %10 {offsets = [0, 0], sizes = [8, 8], strides = [1, 1]} : vector<8x96xf32> to vector<8x8xf32>
    %12 = vector.extract_strided_slice %10 {offsets = [0, 32], sizes = [8, 8], strides = [1, 1]} : vector<8x96xf32> to vector<8x8xf32>
    %13 = vector.extract_strided_slice %10 {offsets = [0, 64], sizes = [8, 8], strides = [1, 1]} : vector<8x96xf32> to vector<8x8xf32>
    %14 = tpu.transpose %12, [1, 0] : vector<8x8xf32> -> vector<8x8xf32>
    %cst_8 = arith.constant dense<0.000000e+00> : vector<8x8xf32>
    %15 = tpu.matmul %11, %14, %cst_8 {dimension_numbers = #tpu.dot_dimension_numbers<[1], [0], [0], [1], [0, 0, 1, 1], [], []>} : vector<8x8xf32>, vector<8x8xf32>, vector<8x8xf32> -> vector<8x8xf32>
    %cst_9 = arith.constant dense<0xFF800000> : vector<8xf32>
    %16 = vector.multi_reduction <maximumf>, %15, %cst_9 [1] : vector<8x8xf32> to vector<8xf32>
    %17 = vector.shape_cast %16 : vector<8xf32> to vector<8x1xf32>
    %18 = vector.broadcast %17 : vector<8x1xf32> to vector<8x8xf32>
    %19 = arith.subf %15, %18 : vector<8x8xf32>
    %20 = math.exp %19 : vector<8x8xf32>
    %cst_10 = arith.constant dense<0.000000e+00> : vector<8xf32>
    %21 = vector.multi_reduction <add>, %20, %cst_10 [1] : vector<8x8xf32> to vector<8xf32>
    %22 = vector.shape_cast %21 : vector<8xf32> to vector<8x1xf32>
    %23 = tpu.reciprocal %22 : vector<8x1xf32> -> vector<8x1xf32>
    %24 = vector.broadcast %23 : vector<8x1xf32> to vector<8x8xf32>
    %25 = arith.mulf %20, %24 : vector<8x8xf32>
    %cst_11 = arith.constant dense<0.000000e+00> : vector<8x8xf32>
    %26 = tpu.matmul %25, %13, %cst_11 {dimension_numbers = #tpu.dot_dimension_numbers<[1], [0], [0], [1], [0, 0, 1, 1], [], []>} : vector<8x8xf32>, vector<8x8xf32>, vector<8x8xf32> -> vector<8x8xf32>
    %27 = vector.extract_strided_slice %10 {offsets = [0, 8], sizes = [8, 8], strides = [1, 1]} : vector<8x96xf32> to vector<8x8xf32>
    %28 = vector.extract_strided_slice %10 {offsets = [0, 40], sizes = [8, 8], strides = [1, 1]} : vector<8x96xf32> to vector<8x8xf32>
    %29 = vector.extract_strided_slice %10 {offsets = [0, 72], sizes = [8, 8], strides = [1, 1]} : vector<8x96xf32> to vector<8x8xf32>
    %30 = tpu.transpose %28, [1, 0] : vector<8x8xf32> -> vector<8x8xf32>
    %cst_12 = arith.constant dense<0.000000e+00> : vector<8x8xf32>
    %31 = tpu.matmul %27, %30, %cst_12 {dimension_numbers = #tpu.dot_dimension_numbers<[1], [0], [0], [1], [0, 0, 1, 1], [], []>} : vector<8x8xf32>, vector<8x8xf32>, vector<8x8xf32> -> vector<8x8xf32>
    %cst_13 = arith.constant dense<0xFF800000> : vector<8xf32>
    %32 = vector.multi_reduction <maximumf>, %31, %cst_13 [1] : vector<8x8xf32> to vector<8xf32>
    %33 = vector.shape_cast %32 : vector<8xf32> to vector<8x1xf32>
    %34 = vector.broadcast %33 : vector<8x1xf32> to vector<8x8xf32>
    %35 = arith.subf %31, %34 : vector<8x8xf32>
    %36 = math.exp %35 : vector<8x8xf32>
    %cst_14 = arith.constant dense<0.000000e+00> : vector<8xf32>
    %37 = vector.multi_reduction <add>, %36, %cst_14 [1] : vector<8x8xf32> to vector<8xf32>
    %38 = vector.shape_cast %37 : vector<8xf32> to vector<8x1xf32>
    %39 = tpu.reciprocal %38 : vector<8x1xf32> -> vector<8x1xf32>
    %40 = vector.broadcast %39 : vector<8x1xf32> to vector<8x8xf32>
    %41 = arith.mulf %36, %40 : vector<8x8xf32>
    %cst_15 = arith.constant dense<0.000000e+00> : vector<8x8xf32>
    %42 = tpu.matmul %41, %29, %cst_15 {dimension_numbers = #tpu.dot_dimension_numbers<[1], [0], [0], [1], [0, 0, 1, 1], [], []>} : vector<8x8xf32>, vector<8x8xf32>, vector<8x8xf32> -> vector<8x8xf32>
    %43 = vector.extract_strided_slice %10 {offsets = [0, 16], sizes = [8, 8], strides = [1, 1]} : vector<8x96xf32> to vector<8x8xf32>
    %44 = vector.extract_strided_slice %10 {offsets = [0, 48], sizes = [8, 8], strides = [1, 1]} : vector<8x96xf32> to vector<8x8xf32>
    %45 = vector.extract_strided_slice %10 {offsets = [0, 80], sizes = [8, 8], strides = [1, 1]} : vector<8x96xf32> to vector<8x8xf32>
    %46 = tpu.transpose %44, [1, 0] : vector<8x8xf32> -> vector<8x8xf32>
    %cst_16 = arith.constant dense<0.000000e+00> : vector<8x8xf32>
    %47 = tpu.matmul %43, %46, %cst_16 {dimension_numbers = #tpu.dot_dimension_numbers<[1], [0], [0], [1], [0, 0, 1, 1], [], []>} : vector<8x8xf32>, vector<8x8xf32>, vector<8x8xf32> -> vector<8x8xf32>
    %cst_17 = arith.constant dense<0xFF800000> : vector<8xf32>
    %48 = vector.multi_reduction <maximumf>, %47, %cst_17 [1] : vector<8x8xf32> to vector<8xf32>
    %49 = vector.shape_cast %48 : vector<8xf32> to vector<8x1xf32>
    %50 = vector.broadcast %49 : vector<8x1xf32> to vector<8x8xf32>
    %51 = arith.subf %47, %50 : vector<8x8xf32>
    %52 = math.exp %51 : vector<8x8xf32>
    %cst_18 = arith.constant dense<0.000000e+00> : vector<8xf32>
    %53 = vector.multi_reduction <add>, %52, %cst_18 [1] : vector<8x8xf32> to vector<8xf32>
    %54 = vector.shape_cast %53 : vector<8xf32> to vector<8x1xf32>
    %55 = tpu.reciprocal %54 : vector<8x1xf32> -> vector<8x1xf32>
    %56 = vector.broadcast %55 : vector<8x1xf32> to vector<8x8xf32>
    %57 = arith.mulf %52, %56 : vector<8x8xf32>
    %cst_19 = arith.constant dense<0.000000e+00> : vector<8x8xf32>
    %58 = tpu.matmul %57, %45, %cst_19 {dimension_numbers = #tpu.dot_dimension_numbers<[1], [0], [0], [1], [0, 0, 1, 1], [], []>} : vector<8x8xf32>, vector<8x8xf32>, vector<8x8xf32> -> vector<8x8xf32>
    %59 = vector.extract_strided_slice %10 {offsets = [0, 24], sizes = [8, 8], strides = [1, 1]} : vector<8x96xf32> to vector<8x8xf32>
    %60 = vector.extract_strided_slice %10 {offsets = [0, 56], sizes = [8, 8], strides = [1, 1]} : vector<8x96xf32> to vector<8x8xf32>
    %61 = vector.extract_strided_slice %10 {offsets = [0, 88], sizes = [8, 8], strides = [1, 1]} : vector<8x96xf32> to vector<8x8xf32>
    %62 = tpu.transpose %60, [1, 0] : vector<8x8xf32> -> vector<8x8xf32>
    %cst_20 = arith.constant dense<0.000000e+00> : vector<8x8xf32>
    %63 = tpu.matmul %59, %62, %cst_20 {dimension_numbers = #tpu.dot_dimension_numbers<[1], [0], [0], [1], [0, 0, 1, 1], [], []>} : vector<8x8xf32>, vector<8x8xf32>, vector<8x8xf32> -> vector<8x8xf32>
    %cst_21 = arith.constant dense<0xFF800000> : vector<8xf32>
    %64 = vector.multi_reduction <maximumf>, %63, %cst_21 [1] : vector<8x8xf32> to vector<8xf32>
    %65 = vector.shape_cast %64 : vector<8xf32> to vector<8x1xf32>
    %66 = vector.broadcast %65 : vector<8x1xf32> to vector<8x8xf32>
    %67 = arith.subf %63, %66 : vector<8x8xf32>
    %68 = math.exp %67 : vector<8x8xf32>
    %cst_22 = arith.constant dense<0.000000e+00> : vector<8xf32>
    %69 = vector.multi_reduction <add>, %68, %cst_22 [1] : vector<8x8xf32> to vector<8xf32>
    %70 = vector.shape_cast %69 : vector<8xf32> to vector<8x1xf32>
    %71 = tpu.reciprocal %70 : vector<8x1xf32> -> vector<8x1xf32>
    %72 = vector.broadcast %71 : vector<8x1xf32> to vector<8x8xf32>
    %73 = arith.mulf %68, %72 : vector<8x8xf32>
    %cst_23 = arith.constant dense<0.000000e+00> : vector<8x8xf32>
    %74 = tpu.matmul %73, %61, %cst_23 {dimension_numbers = #tpu.dot_dimension_numbers<[1], [0], [0], [1], [0, 0, 1, 1], [], []>} : vector<8x8xf32>, vector<8x8xf32>, vector<8x8xf32> -> vector<8x8xf32>
    %75 = tpu.concatenate %26, %42, %58, %74 in 1 : vector<8x8xf32>, vector<8x8xf32>, vector<8x8xf32>, vector<8x8xf32> -> vector<8x32xf32>
    %c0_24 = arith.constant 0 : index
    %c0_25 = arith.constant 0 : index
    %c0_26 = arith.constant 0 : index
    %76 = vector.load %arg5[%c0_24, %c0_25, %c0_26] : memref<1x32x32xf32, #tpu.memory_space<vmem>>, vector<1x32x32xf32>
    %77 = vector.shape_cast %76 : vector<1x32x32xf32> to vector<32x32xf32>
    %cst_27 = arith.constant dense<0.000000e+00> : vector<8x32xf32>
    %78 = tpu.matmul %75, %77, %cst_27 {dimension_numbers = #tpu.dot_dimension_numbers<[1], [0], [0], [1], [0, 0, 1, 1], [], []>} : vector<8x32xf32>, vector<32x32xf32>, vector<8x32xf32> -> vector<8x32xf32>
    %c0_28 = arith.constant 0 : index
    %c0_29 = arith.constant 0 : index
    %c0_30 = arith.constant 0 : index
    %79 = vector.load %arg6[%c0_28, %c0_29, %c0_30] : memref<1x1x32xf32, #tpu.memory_space<vmem>>, vector<1x1x32xf32>
    %80 = vector.shape_cast %79 : vector<1x1x32xf32> to vector<1x32xf32>
    %81 = vector.broadcast %80 : vector<1x32xf32> to vector<8x32xf32>
    %82 = arith.addf %78, %81 : vector<8x32xf32>
    %83 = arith.addf %3, %82 : vector<8x32xf32>
    %c0_31 = arith.constant 0 : index
    %c0_32 = arith.constant 0 : index
    %c0_33 = arith.constant 0 : index
    %84 = vector.load %arg7[%c0_31, %c0_32, %c0_33] : memref<1x1x32xf32, #tpu.memory_space<vmem>>, vector<1x1x32xf32>
    %85 = vector.shape_cast %84 : vector<1x1x32xf32> to vector<1x32xf32>
    %c0_34 = arith.constant 0 : index
    %c0_35 = arith.constant 0 : index
    %c0_36 = arith.constant 0 : index
    %86 = vector.load %arg8[%c0_34, %c0_35, %c0_36] : memref<1x1x32xf32, #tpu.memory_space<vmem>>, vector<1x1x32xf32>
    %87 = vector.shape_cast %86 : vector<1x1x32xf32> to vector<1x32xf32>
    %cst_37 = arith.constant dense<0.000000e+00> : vector<8xf32>
    %88 = vector.multi_reduction <add>, %83, %cst_37 [1] : vector<8x32xf32> to vector<8xf32>
    %89 = vector.shape_cast %88 : vector<8xf32> to vector<8x1xf32>
    %cst_38 = arith.constant 3.200000e+01 : f32
    %90 = vector.broadcast %cst_38 : f32 to vector<8x1xf32>
    %91 = arith.divf %89, %90 : vector<8x1xf32>
    %92 = vector.broadcast %91 : vector<8x1xf32> to vector<8x32xf32>
    %93 = arith.subf %83, %92 : vector<8x32xf32>
    %94 = arith.mulf %93, %93 : vector<8x32xf32>
    %cst_39 = arith.constant dense<0.000000e+00> : vector<8xf32>
    %95 = vector.multi_reduction <add>, %94, %cst_39 [1] : vector<8x32xf32> to vector<8xf32>
    %96 = vector.shape_cast %95 : vector<8xf32> to vector<8x1xf32>
    %cst_40 = arith.constant 3.200000e+01 : f32
    %97 = vector.broadcast %cst_40 : f32 to vector<8x1xf32>
    %98 = arith.divf %96, %97 : vector<8x1xf32>
    %99 = vector.broadcast %91 : vector<8x1xf32> to vector<8x32xf32>
    %100 = arith.subf %83, %99 : vector<8x32xf32>
    %cst_41 = arith.constant 9.99999997E-7 : f32
    %101 = vector.broadcast %cst_41 : f32 to vector<8x1xf32>
    %102 = arith.addf %98, %101 : vector<8x1xf32>
    %103 = math.rsqrt %102 : vector<8x1xf32>
    %104 = vector.broadcast %103 : vector<8x1xf32> to vector<8x32xf32>
    %105 = arith.mulf %100, %104 : vector<8x32xf32>
    %106 = vector.broadcast %85 : vector<1x32xf32> to vector<8x32xf32>
    %107 = arith.mulf %105, %106 : vector<8x32xf32>
    %108 = vector.broadcast %87 : vector<1x32xf32> to vector<8x32xf32>
    %109 = arith.addf %107, %108 : vector<8x32xf32>
    %c0_42 = arith.constant 0 : index
    %c0_43 = arith.constant 0 : index
    %c0_44 = arith.constant 0 : index
    %110 = vector.load %arg9[%c0_42, %c0_43, %c0_44] : memref<1x32x64xf32, #tpu.memory_space<vmem>>, vector<1x32x64xf32>
    %111 = vector.shape_cast %110 : vector<1x32x64xf32> to vector<32x64xf32>
    %cst_45 = arith.constant dense<0.000000e+00> : vector<8x64xf32>
    %112 = tpu.matmul %109, %111, %cst_45 {dimension_numbers = #tpu.dot_dimension_numbers<[1], [0], [0], [1], [0, 0, 1, 1], [], []>} : vector<8x32xf32>, vector<32x64xf32>, vector<8x64xf32> -> vector<8x64xf32>
    %c0_46 = arith.constant 0 : index
    %c0_47 = arith.constant 0 : index
    %c0_48 = arith.constant 0 : index
    %113 = vector.load %arg10[%c0_46, %c0_47, %c0_48] : memref<1x1x64xf32, #tpu.memory_space<vmem>>, vector<1x1x64xf32>
    %114 = vector.shape_cast %113 : vector<1x1x64xf32> to vector<1x64xf32>
    %115 = vector.broadcast %114 : vector<1x64xf32> to vector<8x64xf32>
    %116 = arith.addf %112, %115 : vector<8x64xf32>
    %cst_49 = arith.constant 0.000000e+00 : f32
    %117 = vector.broadcast %cst_49 : f32 to vector<8x64xf32>
    %118 = arith.maximumf %116, %117 : vector<8x64xf32>
    %c0_50 = arith.constant 0 : index
    %c0_51 = arith.constant 0 : index
    %c0_52 = arith.constant 0 : index
    %119 = vector.load %arg11[%c0_50, %c0_51, %c0_52] : memref<1x64x32xf32, #tpu.memory_space<vmem>>, vector<1x64x32xf32>
    %120 = vector.shape_cast %119 : vector<1x64x32xf32> to vector<64x32xf32>
    %cst_53 = arith.constant dense<0.000000e+00> : vector<8x32xf32>
    %121 = tpu.matmul %118, %120, %cst_53 {dimension_numbers = #tpu.dot_dimension_numbers<[1], [0], [0], [1], [0, 0, 1, 1], [], []>} : vector<8x64xf32>, vector<64x32xf32>, vector<8x32xf32> -> vector<8x32xf32>
    %c0_54 = arith.constant 0 : index
    %c0_55 = arith.constant 0 : index
    %c0_56 = arith.constant 0 : index
    %122 = vector.load %arg12[%c0_54, %c0_55, %c0_56] : memref<1x1x32xf32, #tpu.memory_space<vmem>>, vector<1x1x32xf32>
    %123 = vector.shape_cast %122 : vector<1x1x32xf32> to vector<1x32xf32>
    %124 = vector.broadcast %123 : vector<1x32xf32> to vector<8x32xf32>
    %125 = arith.addf %121, %124 : vector<8x32xf32>
    %126 = arith.addf %109, %125 : vector<8x32xf32>
    %c0_57 = arith.constant 0 : index
    %c0_58 = arith.constant 0 : index
    %c0_59 = arith.constant 0 : index
    %127 = vector.load %arg13[%c0_57, %c0_58, %c0_59] : memref<1x1x32xf32, #tpu.memory_space<vmem>>, vector<1x1x32xf32>
    %128 = vector.shape_cast %127 : vector<1x1x32xf32> to vector<1x32xf32>
    %c0_60 = arith.constant 0 : index
    %c0_61 = arith.constant 0 : index
    %c0_62 = arith.constant 0 : index
    %129 = vector.load %arg14[%c0_60, %c0_61, %c0_62] : memref<1x1x32xf32, #tpu.memory_space<vmem>>, vector<1x1x32xf32>
    %130 = vector.shape_cast %129 : vector<1x1x32xf32> to vector<1x32xf32>
    %cst_63 = arith.constant dense<0.000000e+00> : vector<8xf32>
    %131 = vector.multi_reduction <add>, %126, %cst_63 [1] : vector<8x32xf32> to vector<8xf32>
    %132 = vector.shape_cast %131 : vector<8xf32> to vector<8x1xf32>
    %cst_64 = arith.constant 3.200000e+01 : f32
    %133 = vector.broadcast %cst_64 : f32 to vector<8x1xf32>
    %134 = arith.divf %132, %133 : vector<8x1xf32>
    %135 = vector.broadcast %134 : vector<8x1xf32> to vector<8x32xf32>
    %136 = arith.subf %126, %135 : vector<8x32xf32>
    %137 = arith.mulf %136, %136 : vector<8x32xf32>
    %cst_65 = arith.constant dense<0.000000e+00> : vector<8xf32>
    %138 = vector.multi_reduction <add>, %137, %cst_65 [1] : vector<8x32xf32> to vector<8xf32>
    %139 = vector.shape_cast %138 : vector<8xf32> to vector<8x1xf32>
    %cst_66 = arith.constant 3.200000e+01 : f32
    %140 = vector.broadcast %cst_66 : f32 to vector<8x1xf32>
    %141 = arith.divf %139, %140 : vector<8x1xf32>
    %142 = vector.broadcast %134 : vector<8x1xf32> to vector<8x32xf32>
    %143 = arith.subf %126, %142 : vector<8x32xf32>
    %cst_67 = arith.constant 9.99999997E-7 : f32
    %144 = vector.broadcast %cst_67 : f32 to vector<8x1xf32>
    %145 = arith.addf %141, %144 : vector<8x1xf32>
    %146 = math.rsqrt %145 : vector<8x1xf32>
    %147 = vector.broadcast %146 : vector<8x1xf32> to vector<8x32xf32>
    %148 = arith.mulf %143, %147 : vector<8x32xf32>
    %149 = vector.broadcast %128 : vector<1x32xf32> to vector<8x32xf32>
    %150 = arith.mulf %148, %149 : vector<8x32xf32>
    %151 = vector.broadcast %130 : vector<1x32xf32> to vector<8x32xf32>
    %152 = arith.addf %150, %151 : vector<8x32xf32>
    %c0_68 = arith.constant 0 : index
    %c0_69 = arith.constant 0 : index
    %153 = vector.load %arg15[%c0_68, %c0_69] : memref<8x32xf32, #tpu.memory_space<vmem>>, vector<8x32xf32>
    tpu.vector_store %arg15[%c0_68, %c0_69], %152 {strides = array<i32>} : memref<8x32xf32, #tpu.memory_space<vmem>>, vector<8x32xf32>,
    return
  }
  func.func @transform_0(%arg0: i32, %arg1: i32) -> (i32, i32) {
    %c0_i32 = arith.constant 0 : i32
    %c0_i32_0 = arith.constant 0 : i32
    return %arg0, %c0_i32 : i32, i32
  }
  func.func @transform_1(%arg0: i32, %arg1: i32) -> (i32, i32, i32) {
    %c0_i32 = arith.constant 0 : i32
    %c0_i32_0 = arith.constant 0 : i32
    %c0_i32_1 = arith.constant 0 : i32
    return %arg1, %c0_i32, %c0_i32_0 : i32, i32, i32
  }
  func.func @transform_2(%arg0: i32, %arg1: i32) -> (i32, i32, i32) {
    %c0_i32 = arith.constant 0 : i32
    %c0_i32_0 = arith.constant 0 : i32
    %c0_i32_1 = arith.constant 0 : i32
    return %arg1, %c0_i32, %c0_i32_0 : i32, i32, i32
  }
  func.func @transform_3(%arg0: i32, %arg1: i32) -> (i32, i32, i32) {
    %c0_i32 = arith.constant 0 : i32
    %c0_i32_0 = arith.constant 0 : i32
    %c0_i32_1 = arith.constant 0 : i32
    return %arg1, %c0_i32, %c0_i32_0 : i32, i32, i32
  }
  func.func @transform_4(%arg0: i32, %arg1: i32) -> (i32, i32, i32) {
    %c0_i32 = arith.constant 0 : i32
    %c0_i32_0 = arith.constant 0 : i32
    %c0_i32_1 = arith.constant 0 : i32
    return %arg1, %c0_i32, %c0_i32_0 : i32, i32, i32
  }
  func.func @transform_5(%arg0: i32, %arg1: i32) -> (i32, i32, i32) {
    %c0_i32 = arith.constant 0 : i32
    %c0_i32_0 = arith.constant 0 : i32
    %c0_i32_1 = arith.constant 0 : i32
    return %arg1, %c0_i32, %c0_i32_0 : i32, i32, i32
  }
  func.func @transform_6(%arg0: i32, %arg1: i32) -> (i32, i32, i32) {
    %c0_i32 = arith.constant 0 : i32
    %c0_i32_0 = arith.constant 0 : i32
    %c0_i32_1 = arith.constant 0 : i32
    return %arg1, %c0_i32, %c0_i32_0 : i32, i32, i32
  }
  func.func @transform_7(%arg0: i32, %arg1: i32) -> (i32, i32, i32) {
    %c0_i32 = arith.constant 0 : i32
    %c0_i32_0 = arith.constant 0 : i32
    %c0_i32_1 = arith.constant 0 : i32
    return %arg1, %c0_i32, %c0_i32_0 : i32, i32, i32
  }
  func.func @transform_8(%arg0: i32, %arg1: i32) -> (i32, i32, i32) {
    %c0_i32 = arith.constant 0 : i32
    %c0_i32_0 = arith.constant 0 : i32
    %c0_i32_1 = arith.constant 0 : i32
    return %arg1, %c0_i32, %c0_i32_0 : i32, i32, i32
  }
  func.func @transform_9(%arg0: i32, %arg1: i32) -> (i32, i32, i32) {
    %c0_i32 = arith.constant 0 : i32
    %c0_i32_0 = arith.constant 0 : i32
    %c0_i32_1 = arith.constant 0 : i32
    return %arg1, %c0_i32, %c0_i32_0 : i32, i32, i32
  }
  func.func @transform_10(%arg0: i32, %arg1: i32) -> (i32, i32, i32) {
    %c0_i32 = arith.constant 0 : i32
    %c0_i32_0 = arith.constant 0 : i32
    %c0_i32_1 = arith.constant 0 : i32
    return %arg1, %c0_i32, %c0_i32_0 : i32, i32, i32
  }
  func.func @transform_11(%arg0: i32, %arg1: i32) -> (i32, i32, i32) {
    %c0_i32 = arith.constant 0 : i32
    %c0_i32_0 = arith.constant 0 : i32
    %c0_i32_1 = arith.constant 0 : i32
    return %arg1, %c0_i32, %c0_i32_0 : i32, i32, i32
  }
  func.func @transform_12(%arg0: i32, %arg1: i32) -> (i32, i32, i32) {
    %c0_i32 = arith.constant 0 : i32
    %c0_i32_0 = arith.constant 0 : i32
    %c0_i32_1 = arith.constant 0 : i32
    return %arg1, %c0_i32, %c0_i32_0 : i32, i32, i32
  }
  func.func @transform_13(%arg0: i32, %arg1: i32) -> (i32, i32) {
    %c0_i32 = arith.constant 0 : i32
    %c0_i32_0 = arith.constant 0 : i32
    return %arg0, %c0_i32 : i32, i32
  }
}

</mosaic_0001>

<bundles_post_ra>
// kernel: _lambda_.1
= control target key start
LH: loop header
LB: loop body
LE: loop exit
PB: predicated region body
PF: predicated region fallthrough
CT: control target
= control target key end

     0   :  { %s2603_s0 = inlined_call_operand.hbm [shape: f32[16,32], index: 0, kind: input, shape index: {}]   ;;  %s2604_s1 = inlined_call_operand.vmem [shape: f32[2,32,96], index: 1, kind: input, shape index: {}]   ;;  %s2605_s2 = inlined_call_operand.vmem [shape: f32[2,1,96], index: 2, kind: input, shape index: {}]   ;;  %s2606_s3 = inlined_call_operand.vmem [shape: f32[2,32,32], index: 3, kind: input, shape index: {}]   ;;  %s2607_s4 = inlined_call_operand.vmem [shape: f32[2,1,32], index: 4, kind: input, shape index: {}]   ;;  %s2608_s5 = inlined_call_operand.hbm [shape: f32[2,1,32], index: 5, kind: input, shape index: {}]   ;;  %s2609_s6 = inlined_call_operand.hbm [shape: f32[2,1,32], index: 6, kind: input, shape index: {}]   ;;  %s2610_s7 = inlined_call_operand.vmem [shape: f32[2,32,64], index: 7, kind: input, shape index: {}]   ;;  %s2611_s8 = inlined_call_operand.hbm [shape: f32[2,1,64], index: 8, kind: input, shape index: {}]   ;;  %s2612_s9 = inlined_call_operand.vmem [shape: f32[2,64,32], index: 9, kind: input, shape index: {}]   ;;  %s2613_s10 = inlined_call_operand.hbm [shape: f32[2,1,32], index: 10, kind: input, shape index: {}]   ;;  %s2614_s11 = inlined_call_operand.vmem [shape: f32[2,1,32], index: 11, kind: input, shape index: {}]   ;;  %s2615_s12 = inlined_call_operand.hbm [shape: f32[2,1,32], index: 12, kind: input, shape index: {}]   ;;  %s2616_s13 = inlined_call_operand.hbm [shape: f32[16,32], index: 13, kind: output, shape index: {}]  }
   0x1   :  { %2632 = sst [smem:[#allocation33_spill]] %s2603_s0 }
   0x2   :  { %2633 = sst [smem:[#allocation34_spill]] %s2604_s1 }
   0x3   :  { %2634 = sst [smem:[#allocation35_spill]] %s2605_s2 }
   0x4   :  { %2635 = sst [smem:[#allocation36_spill]] %s2606_s3 }
   0x5   :  { %2636 = sst [smem:[#allocation37_spill]] %s2607_s4 }
   0x6   :  { %2637 = sst [smem:[#allocation38_spill]] %s2608_s5 }
   0x7   :  { %2638 = sst [smem:[#allocation39_spill]] %s2609_s6 }
   0x8   :  { %2639 = sst [smem:[#allocation40_spill]] %s2610_s7 }
   0x9   :  { %2640 = sst [smem:[#allocation41_spill]] %s2611_s8 }
   0xa   :  { %2641 = sst [smem:[#allocation42_spill]] %s2612_s9 }
   0xb   :  { %2642 = sst [smem:[#allocation43_spill]] %s2613_s10 }
   0xc   :  { %2643 = sst [smem:[#allocation44_spill]] %s2614_s11 }
   0xd   :  { %2644 = sst [smem:[#allocation45_spill]] %s2615_s12 }
   0xe   :  { %2645 = sst [smem:[#allocation46_spill]] %s2616_s13 }
   0xf   :  { %18 = vsyncpa [#allocation3], 0 }
  0x10   :  { %20 = vsyncpa [#allocation3 + $0x1], 0 }
  0x11   :  { %21 = vsyncpa [#allocation6], 0 }
  0x12   :  { %23 = vsyncpa [#allocation6 + $0x1], 0 }
  0x13   :  { %24 = vsyncpa [#allocation9], 0 }
  0x14   :  { %26 = vsyncpa [#allocation9 + $0x1], 0 }
  0x15   :  { %27 = vsyncpa [#allocation12], 0 }
  0x16   :  { %29 = vsyncpa [#allocation12 + $0x1], 0 }
  0x17   :  { %30 = vsyncpa [#allocation4], 0 }
  0x18   :  { %32 = vsyncpa [#allocation4 + $0x1], 0  ;;  %s2179_s25 = smov 0   ;;  %s2181_s26 = smov 0  }
  0x19   :  { %s2183_s27 = smov 0   ;;  %s2185_s28 = smov 0  }
  0x1a   :  { %s2187_s29 = smov 0   ;;  %s2189_s30 = smov 0  }
  0x1b   :  { %s2191_s14 = smov 0   ;;  %s2193_s15 = smov 0  }
  0x1c   :  { %s2195_s16 = smov 0   ;;  %s2197_s17 = smov 0  }
  0x1d   :  { %s2199_s18 = smov 0  }
  0x1e LB: > { %2646 = sst [smem:[#allocation19_spill]] %s2056_s26  ;;  %p65_p0 = scmp.eq.s32.totalorder %s2092_s18, 0  ;;  %s2092_s18 = sphi %s2199_s18, %s38_s18   ;;  %s2088_s17 = sphi %s2197_s17, %s2704_s17   ;;  %s2084_s16 = sphi %s2195_s16, %s2703_s16   ;;  %s2080_s15 = sphi %s2193_s15, %s2702_s15   ;;  %s2076_s14 = sphi %s2191_s14, %s2701_s14   ;;  %s2072_s30 = sphi %s2189_s30, %s2700_s30   ;;  %s2068_s29 = sphi %s2187_s29, %s2699_s29   ;;  %s2064_s28 = sphi %s2185_s28, %s2698_s28   ;;  %s2060_s27 = sphi %s2183_s27, %s2697_s27   ;;  %s2056_s26 = sphi %s2181_s26, %s2696_s26   ;;  %s2052_s25 = sphi %s2179_s25, %s2695_s25  }
  0x1f   : > { %2647 = sst [smem:[#allocation20_spill]] %s2060_s27  ;;  %p194_p1 = scmp.ne.s32.totalorder %s2060_s27, %s2056_s26 }
  0x20   : > { %2648 = sst [smem:[#allocation21_spill]] %s2068_s29  ;;  %p2619_p2 = scmp.lt.s32.totalorder %s2092_s18, 4 }
  0x21   : > { %2649 = sst [smem:[#allocation22_spill]] %s2072_s30  ;;  %s479_s20 = sand.u32 1, %s2092_s18  }
  0x22   : > { %2650 = sst [smem:[#allocation23_spill]] %s2076_s14  ;;  %p196_p3 = por %p194_p1, %p65_p0 }
  0x23   : > { %2651 = sst [smem:[#allocation24_spill]] %s2080_s15  ;;  %s2243_s21 = sand.u32 1, %s2060_s27  }
  0x24   : > { %2652 = sst [smem:[#allocation25_spill]] %s2084_s16  ;;  %s482_s15 = scalar_lea.vmem [#allocation5], %s2243_s21 }
  0x25   : > { %2653 = sst [smem:[#allocation26_spill]] %s2088_s17  ;;  %s489_s9 = sshll.u32 %s482_s15, 4  ;;  %s490_s9 = int_to_ptr.vmem [resolvable:$true] %s489_s9 }
  0x26   : > { %s2654_s5 = sld [smem:[#allocation38_spill]]  ;;  %p2252_p4 = pnand %p2619_p2, %p196_p3 }
  0x27   : > { %p1570_p5 = scmp.ge.s32.totalorder %s2092_s18, 1  ;;  %p584_p6 = scmp.lt.s32.totalorder %s2092_s18, 5 }
  0x28   : > { %s2258_s22 = scalar_lea.sflag [#allocation6], %s479_s20  ;;  %s2657_s8 = sld [smem:[#allocation41_spill]] }
  0x29   : > { %p2263_p7 = pnand %p1570_p5, %p584_p6  ;;  %s524_s11 = scalar_lea.vmem [#allocation8], %s2243_s21 }
  0x2a   : > { %s531_s7 = sshll.u32 %s524_s11, 4  ;;  %s1565_s23 = sadd.s32 4294967294, %s2092_s18   ;;  %s532_s7 = int_to_ptr.vmem [resolvable:$true] %s531_s7 }
  0x2b   : > { %s47_s11 = sadd.s32 1, %s2084_s16  ;;  %p64_p9 = scmp.ne.s32.totalorder %s2072_s30, %s2068_s29 }
  0x2c   : > { %s485_s24 = scalar_lea.hbm %s2654_s5, %s2084_s16  ;;  %p48_p8 = scmp.ge.s32.totalorder %s47_s11, 2 }
  0x2d   : > { %s487_s13 = sshll.u32 %s485_s24, 4  ;;  %s57_s24 = sadd.s32 1, %s2072_s30  ;;  %s488_s13 = int_to_ptr.hbm [resolvable:$true] %s487_s13 }
  0x2e   : > { %1626 = dma.hbm_to_vmem [thread:$0]  (!%p2252_p4), %s488_s13, 16, %s490_s9, %s2258_s22  }
  0x2f   : > { %s527_s5 = scalar_lea.hbm %s2657_s8, %s2084_s16  ;;  %s2272_s9 = scalar_lea.sflag [#allocation9], %s479_s20 }
  0x30   : > { %s529_s4 = sshll.u32 %s527_s5, 4  ;;  %s2278_s13 = sadd.s32 4294967295, %s2092_s18   ;;  %s530_s4 = int_to_ptr.hbm [resolvable:$true] %s529_s4 }
  0x31   : > { %1632 = dma.hbm_to_vmem [thread:$0]  (!%p2252_p4), %s530_s4, 16, %s532_s7, %s2272_s9  }
  0x32   : > { %s50_s5 = sadd.s32 1, %s2088_s17  ;;  %s2706_s11 = smov (%p48_p8, %s47_s11), 0 }
  0x33   : > { %2658 = sst [smem:[#allocation27_spill]] %s2706_s11  ;;  %s2708_s5 = smov (!%p48_p8, %s50_s5), %s2088_s17 }
  0x34   : > { %p2294_p10 = por %p65_p0, %p64_p9  ;;  %p70_p11 = scmp.ne.s32.totalorder %s2068_s29, %s2064_s28 }
  0x35   : > { %p52_p12 = scmp.ge.s32.totalorder %s2708_s5, 2  ;;  %p71_p13 = scmp.eq.s32.totalorder %s2278_s13, 0 }
  0x36   : > { %s184_s7 = ssub.s32 %s2084_s16, %s2706_s11  ;;  %p200_p1 = scmp.ne.s32.totalorder %s2056_s26, %s2052_s25 }
  0x37   : > { %s2710_s5 = smov (%p52_p12, %s2708_s5), 0  ;;  %p2310_p3 = por %p71_p13, %p70_p11 }
  0x38   : > { %2660 = sst [smem:[#allocation28_spill]] %s2710_s5  ;;  %p185_p0 = scmp.eq.s32.totalorder %s184_s7, 0 }
  0x39   : > { %s54_s8 = ssub.s32 %s2088_s17, %s2710_s5  ;;  %p2316_p5 = por %p200_p1, %p71_p13 }
  0x3a   : > { %p55_p6 = scmp.eq.s32.totalorder %s54_s8, 0  ;;  %p406_p8 = scmp.eq.s32.totalorder %s2278_s13, 3 }
  0x3b   : > { %s2662_s3 = scalar_select %p2316_p5, 1, 0 }
  0x3c   : > { %s2664_s11 = sadd.s32 1, %s2060_s27  ;;  %p2332_p12 = por %p406_p8, %p64_p9 }
  0x3d   : > { %2663 = sst [smem:[#allocation29_spill]] %s2662_s3  ;;  %p412_p2 = scmp.eq.s32.totalorder %s1565_s23, 3 }
  0x3e   : > { %s2324_s25 = scalar_select %p185_p0, %s2060_s27, %s2664_s11  }
  0x3f   : > { %s2327_s1 = scalar_select %p55_p6, %s2072_s30, %s57_s24  }
  0x40   : > { %2665 = sst [smem:[#allocation30_spill]] %s2324_s25  ;;  %s432_s7 = sand.u32 1, %s2072_s30  }
  0x41   : > { %2666 = sst [smem:[#allocation31_spill]] %s2327_s1  ;;  %s1569_s5 = sshll.u32 %s2088_s17, 3 }
  0x42   : > { %p2341_p13 = por %p412_p2, %p70_p11  ;;  %s1568_s14 = sshll.u32 %s432_s7, 3 }
  0x43   : > { %s2670_s0 = sld [smem:[#allocation33_spill]]  ;;  %s436_s23 = scalar_lea.vmem [#allocation2], %s1568_s14 }
  0x44   : > { %s2668_s8 = scalar_select %p2341_p13, 1, 0 }
  0x45   : > { %s444_s30 = sshll.u32 %s436_s23, 4  ;;  %p2671_p9 = scmp.lt.s32.totalorder %s2092_s18, 4  ;;  %s445_s30 = int_to_ptr.vmem [resolvable:$true] %s444_s30 }
  0x46   : > { %2669 = sst [smem:[#allocation32_spill]] %s2668_s8  ;;  %s433_s11 = scalar_lea.sflag [#allocation3], %s432_s7 }
  0x47   : > { %p1621_p2 = pnand %p2671_p9, %p2294_p10  ;;  %s2672_s6 = sld [smem:[#allocation39_spill]] }
  0x48   : > { %s2673_s10 = sld [smem:[#allocation43_spill]]  ;;  %s549_s25 = scalar_lea.vmem [#allocation10], %s2243_s21 }
  0x49   : > { %s440_s24 = scalar_lea.hbm %s2670_s0, %s1569_s5  ;;  %s499_s5 = scalar_lea.vmem [#allocation7], %s2243_s21 }
  0x4a   : > { %s442_s1 = sshll.u32 %s440_s24, 4  ;;  %s506_s24 = sshll.u32 %s499_s5, 4  ;;  %s443_s1 = int_to_ptr.hbm [resolvable:$true] %s442_s1  ;;  %s507_s24 = int_to_ptr.vmem [resolvable:$true] %s506_s24 }
  0x4b   : > { %1623 = dma.hbm_to_vmem [thread:$0]  (!%p1621_p2), %s443_s1, 128, %s445_s30, %s433_s11  }
  0x4c   : > { %s556_s23 = sshll.u32 %s549_s25, 4  ;;  %s2674_s12 = sld [smem:[#allocation45_spill]]  ;;  %s557_s23 = int_to_ptr.vmem [resolvable:$true] %s556_s23 }
  0x4d   : > { %s502_s27 = scalar_lea.hbm %s2672_s6, %s2084_s16  ;;  %s572_s11 = scalar_lea.vmem [#allocation11], %s2243_s21 }
  0x4e   : > { %s504_s3 = sshll.u32 %s502_s27, 4  ;;  %s552_s17 = scalar_lea.hbm %s2673_s10, %s2084_s16  ;;  %s505_s3 = int_to_ptr.hbm [resolvable:$true] %s504_s3 }
  0x4f   : > { %1629 = dma.hbm_to_vmem [thread:$0]  (!%p2252_p4), %s505_s3, 16, %s507_s24, %s2258_s22  }
  0x50   : > { %s554_s0 = sshll.u32 %s552_s17, 4  ;;  %s579_s5 = sshll.u32 %s572_s11, 4  ;;  %s555_s0 = int_to_ptr.hbm [resolvable:$true] %s554_s0  ;;  %s580_s5 = int_to_ptr.vmem [resolvable:$true] %s579_s5 }
  0x51   : > { %1635 = dma.hbm_to_vmem [thread:$0]  (!%p2252_p4), %s555_s0, 16, %s557_s23, %s2272_s9  }
  0x52   : > { %s575_s30 = scalar_lea.hbm %s2674_s12, %s2084_s16  ;;  %s570_s22 = scalar_lea.sflag [#allocation12], %s2243_s21 }
  0x53   : > { %s577_s7 = sshll.u32 %s575_s30, 4  ;;  %588 = sbr.rel (%p2263_p7) target bundleno = 2364 (0x93c), region = 72  ;;  %s578_s7 = int_to_ptr.hbm [resolvable:$true] %s577_s7 }
  0x54   : > { %1638 = dma.hbm_to_vmem [thread:$0]  (!%p2252_p4), %s578_s7, 16, %s580_s5, %s570_s22  }
  0x55   : > { %s2379_s3 = sand.u32 (!%p2263_p7), 1, %s2068_s29  }
  0x56   : > { %s2627_s0 = sshll.u32 (!%p2263_p7), %s2379_s3, 3  ;;  %s591_s9 = scalar_lea.sflag (!%p2263_p7), [#allocation3], %s2379_s3 }
  0x57   : > { %s2385_s24 = scalar_lea.vmem (!%p2263_p7), [#allocation2], %s2627_s0 }
  0x58   : > { %2031 = dma.done.wait (%p2310_p3), %s591_s9, 128  }
  0x59   : > { %2033 = vsyncadd (%p2310_p3), %s591_s9, 4294967168  ;;  %s600_s21 = sand.u32 1, %s2278_s13   ;;  %s2393_s15 = sand.u32 1, %s2056_s26  }
  0x5a   : > { %s601_s14 = scalar_lea.sflag [#allocation6], %s600_s21 }
  0x5b   : > { %2035 = dma.done.wait (%p2316_p5), %s601_s14, 32  }
  0x5c   : > { %2037 = vsyncadd (%p2316_p5), %s601_s14, 4294967264  ;;  %s619_s20 = scalar_lea.sflag [#allocation9], %s600_s21 }
  0x5d   : > { %2039 = dma.done.wait (%p2316_p5), %s619_s20, 32  }
  0x5e   : > { %2041 = vsyncadd (%p2316_p5), %s619_s20, 4294967264  ;;  %s637_s23 = scalar_lea.sflag [#allocation12], %s2393_s15 }
  0x5f   : > { %2043 = dma.done.wait (%p2316_p5), %s637_s23, 16  }
  0x60   : > { %2045 = vsyncadd (%p2316_p5), %s637_s23, 4294967280  ;;  %s2676_s27 = sld [smem:[#allocation23_spill]] }
  0x61   : > { %s2677_s22 = sld [smem:[#allocation35_spill]] }
  0x62   : > { %s2678_s19 = sld [smem:[#allocation34_spill]] }
  0x63   : > { %s2679_s13 = sld [smem:[#allocation36_spill]] }
  0x64   : > { %s2680_s0 = sld [smem:[#allocation37_spill]] }
  0x65   : > { %s2681_s16 = sld [smem:[#allocation40_spill]] }
  0x66   : > { %p732_p4 = scmp.lt.s32.totalorder %s2676_s27, 1  ;;  %s2682_s26 = sld [smem:[#allocation44_spill]] }
  0x67   : > { %s2683_s8 = sld [smem:[#allocation42_spill]]  ;;  %p1581_p7 = scmp.ne.s32.totalorder %s2676_s27, 0 }
  0x68   : > { %s2415_s30 = scalar_select %p732_p4, %s2676_s27, 1 }
  0x6a   : > { %s1602_s7 = sshll.u32 %s2415_s30, 5  ;;  %s739_s9 = scalar_lea.vmem %s2677_s22, %s2415_s30 }
  0x6b   : > { %s736_s20 = scalar_lea.vmem %s2678_s19, %s1602_s7  ;;  %s2428_s25 = scalar_lea.vmem %s2679_s13, %s1602_s7 }
  0x6c   : > { %s747_s6 = scalar_lea.vmem %s2680_s0, %s2415_s30  ;;  %s2437_s29 = scalar_lea.vmem %s2681_s16, %s1602_s7 }
  0x6d   : > { %s1605_s11 = sshll.u32 %s2415_s30, 6  ;;  %s760_s21 = scalar_lea.vmem %s2682_s26, %s2415_s30 }
  0x6e   : > { %s2447_s1 = scalar_lea.vmem %s2683_s8, %s1605_s11  ;;  %s2684_s13 = sshll.u32 %s2379_s3, 3 }
  0x6f   : > { %s2451_s23 = scalar_lea.vmem [#allocation13], %s2684_s13  ;;  %764 = sbr.rel (%p1581_p7) target bundleno = 118 (0x76), region = 100 }
  0x74   : > { %v765_v0 = vld [vmem:[%s2385_s24] sm:$0xff]  ;;  %vm766_vm0 = vcmask 261120  }
  0x75   : > { %767 = vst.msk [vmem:[%s2451_s23] sm:$0xff] %vm766_vm0, %v765_v0 }
  0x76 PF: > { %v772_v1 = vld [vmem:[%s736_s20 + $0x18] sm:$0xff]  ;;  %v771_v2 = vld [vmem:[%s736_s20 + $0x10] sm:$0xff]  ;;  %v770_v3 = vld [vmem:[%s736_s20 + $0x8] sm:$0xff]  ;;  %vm777_vm1 = vcmask 261120   ;;  %s2094_s10 = smov 64   ;;  %s2095_s12 = smov 120  }
  0x77   : > { %793 = vmatpush.msra.mxu0 %v772_v1  ;;  %v769_v4 = vld [vmem:[%s736_s20] sm:$0xff]  ;;  %s2096_s26 = smov 96   ;;  %s2097_s16 = smov 56   ;;  %vm804_vm2 = vcmask 64512  }
  0x78   : > { %v1748_v6 = vld [vmem:[%s739_s9] ss:$0 sm:$0xff]  ;;  %s2098_s8 = smov 88   ;;  %s2099_s0 = smov 104  }
  0x79   : > { %794 = vmatpush.msra.mxu0 %v771_v2  ;;  %s2100_s24 = smov 72   ;;  %s2101_s4 = smov 80  }
  0x7a   : > { %s2102_s17 = smov 112   ;;  %s2103_s27 = smov 40  }
  0x7b   : > { %795 = vmatpush.msra.mxu0 %v770_v3  ;;  %s2104_s7 = smov 8   ;;  %s2105_s9 = smov 48  }
  0x7c   : > { %v2457_v5 = vld [vmem:[%s2451_s23] sm:$0xff]  ;;  %s2106_s20 = smov 16   ;;  %s2107_s11 = smov 24  }
  0x7d   : > { %796 = vmatpush.msra.mxu0 %v769_v4  ;;  %s2689_s19 = scalar_lea.vmem [#allocation10], %s2393_s15  ;;  %s2690_s13 = sld [smem:[#allocation24_spill]] }
  0x7e   : > { %1582 = vmatmul.msk.f32.vlgmr.msra.gmra.mxu0 %vm777_vm1, %v2457_v5 }
  0xfb   : > { %v798_v7 = vpop.f32.mrf.mxu0 }
  0xfc   : > { %v2461_v8 = vadd.f32 %v1748_v6, %v798_v7 }
  0xfe   : > { %853 = vrot.lane.b32.xlu2 %v2461_v8, %s2094_s10  ;;  %879 = vrot.lane.b32.xlu1 %v2461_v8, %s2095_s12 }
  0xff   : > { %802 = vrot.lane.b32.xlu0 %v2461_v8, %s2096_s26 }
 0x106   : > { %931 = vrot.lane.b32.xlu2 %v2461_v8, %s2097_s16 }
 0x107   : > { %881 = vrot.lane.b32.xlu0 %v2461_v8, %s2098_s8 }
 0x158   : > { %v854_v9 = vpop.permute.xlu2 %853 }
 0x159   : > { %874 = vmatpush.msra.mxu2 %v854_v9 }
 0x160   : > { %v932_v10 = vpop.permute.xlu2 %931 }
 0x161   : > { %952 = vmatpush.msrb.mxu2 %v932_v10 }
 0x170   : > { %v880_v13 = vpop.permute.xlu1 %879 }
 0x171   : > { %v803_v11 = vpop.permute.xlu0 %802 }
 0x172   : > { %1583 = vmatpush.xpose.msk.msra.mxu1 %vm804_vm2, %v803_v11 }
 0x175   : > { %1584 = vmatmul.msk.f32.vlgmr.msra.gmra.mxu1 %vm804_vm2, %v2461_v8 }
 0x179   : > { %v882_v12 = vpop.permute.xlu0 %881 }
 0x17a   : > { %1586 = vmatpush.xpose.msk.msra.mxu3 %vm804_vm2, %v882_v12 }
 0x17d   : > { %1587 = vmatmul.msk.f32.vlgmr.msra.gmra.mxu3 %vm804_vm2, %v880_v13 }
 0x1f2   : > { %v826_v14 = vpop.f32.mrf.mxu1 }
 0x1f3   : > { %v829_v15 = vsel %vm804_vm2, %v826_v14, -inf }
 0x1f4   : > { %830 = vmax.xlane.f32.xlu1 %v829_v15 }
 0x200   : > { %v904_v16 = vpop.f32.mrf.mxu3 }
 0x201   : > { %v907_v17 = vsel %vm804_vm2, %v904_v16, -inf }
 0x202   : > { %908 = vmax.xlane.f32.xlu2 %v907_v17 }
 0x20d   : > { %1035 = vrot.lane.b32.xlu1 %v2461_v8, %s2099_s0  ;;  %s2692_s0 = sld [smem:[#allocation46_spill]] }
 0x21a   : > { %1037 = vrot.lane.b32.xlu2 %v2461_v8, %s2100_s24 }
 0x267   : > { %v831_v18 = vpop.xlane.xlu1 %830 }
 0x268   : > { %v832_v19 = vsub.f32 %v826_v14, %v831_v18 }
 0x26a   : > { %v833_v20 = vmul.f32 1.442695, %v832_v19 }
 0x26c   : > { %1756 = vpow2.f32 %v833_v20 }
 0x272   : > { %v1757_v21 = vpop.eup %1756 }
 0x273   : > { %v835_v22 = vsel %vm804_vm2, %v1757_v21, 0.0 }
 0x274   : > { %836 = vadd.xlane.f32.xlu2 %v835_v22 }
 0x275   : > { %v909_v23 = vpop.xlane.xlu2 %908 }
 0x276   : > { %v910_v24 = vsub.f32 %v904_v16, %v909_v23 }
 0x278   : > { %v911_v25 = vmul.f32 1.442695, %v910_v24 }
 0x27a   : > { %1758 = vpow2.f32 %v911_v25 }
 0x27d   : > { %v1038_v28 = vpop.permute.xlu2 %1037 }
 0x27f   : > { %v1036_v55 = vpop.permute.xlu1 %1035 }
 0x280   : > { %v1759_v26 = vpop.eup %1758 }
 0x281   : > { %v913_v27 = vsel %vm804_vm2, %v1759_v26, 0.0 }
 0x282   : > { %914 = vadd.xlane.f32.xlu0 %v913_v27 }
 0x28c   : > { %959 = vrot.lane.b32.xlu2 %v2461_v8, %s2101_s4  ;;  %s2693_s4 = scalar_lea.vmem [#allocation11], %s2393_s15 }
 0x296   : > { %957 = vrot.lane.b32.xlu0 %v2461_v8, %s2102_s17  ;;  %s1316_s17 = sshll.u32 %s2451_s23, 4  ;;  %s1317_s17 = int_to_ptr.vmem [resolvable:$true] %s1316_s17 }
 0x2e7   : > { %v837_v29 = vpop.xlane.xlu2 %836 }
 0x2e8   : > { %1760 = vrcp.f32 %v837_v29  ;;  %v849_v34 = vand.u32 2147483648, %v837_v29  ;;  %v847_v36 = vand.u32 2147483647, %v837_v29  ;;  %vm843_vm4 = vweird.f32 %v837_v29 }
 0x2ea   : > { %v850_v39 = vor.u32 1.1754944e-38, %v849_v34  ;;  %vm848_vm6 = vcmp.eq.f32.partialorder %v847_v36, 8.507059e+37 }
 0x2ee   : > { %v1761_v30 = vpop.eup %1760 }
 0x2ef   : > { %v839_v31 = vmul.f32 %v1761_v30, %v837_v29  ;;  %v960_v32 = vpop.permute.xlu2 %959  ;;  %vm844_vm3 = vweird.f32 %v1761_v30 }
 0x2f0   : > { %1589 = vmatpush.xpose.msk.msrb.mxu1 %vm804_vm2, %v960_v32  ;;  %vm845_vm5 = vmor %vm843_vm4, %vm844_vm3 }
 0x2f1   : > { %v840_v33 = vsub.f32 1.0, %v839_v31 }
 0x2f3   : > { %v841_v35 = vmul.f32 %v1761_v30, %v840_v33 }
 0x2f5   : > { %v915_v37 = vpop.xlane.xlu0 %914  ;;  %v842_v38 = vadd.f32 %v1761_v30, %v841_v35 }
 0x2f6   : > { %1762 = vrcp.f32 %v915_v37  ;;  %v927_v46 = vand.u32 2147483648, %v915_v37  ;;  %v925_v48 = vand.u32 2147483647, %v915_v37  ;;  %vm921_vm8 = vweird.f32 %v915_v37 }
 0x2f7   : > { %v846_v40 = vsel %vm845_vm5, %v1761_v30, %v842_v38  ;;  %v1132_v38 = vld [vmem:[%s2428_s25 + $0x10] sm:$0xff]  ;;  %vm1126_vm5 = vcmask 130048  }
 0x2f8   : > { %v851_v41 = vsel %vm848_vm6, %v850_v39, %v846_v40  ;;  %v928_v50 = vor.u32 1.1754944e-38, %v927_v46  ;;  %vm926_vm10 = vcmp.eq.f32.partialorder %v925_v48, 8.507059e+37  ;;  %v1131_v39 = vld [vmem:[%s2428_s25 + $0x8] sm:$0xff]  ;;  %v1130_v40 = vld [vmem:[%s2428_s25] sm:$0xff]  ;;  %vm1128_vm6 = vcmask 195584  }
 0x2f9   : > { %v852_v42 = vmul.f32 %v1757_v21, %v851_v41 }
 0x2fb   : > { %1585 = vmatmul.msk.f32.vlgmr.msra.gmra.mxu2 %vm804_vm2, %v852_v42 }
 0x2fc   : > { %v1763_v43 = vpop.eup %1762  ;;  %1592 = vmatpush.xpose.msk.msra.mxu2 %vm804_vm2, %v1038_v28 }
 0x2fd   : > { %v917_v44 = vmul.f32 %v1763_v43, %v915_v37  ;;  %vm922_vm7 = vweird.f32 %v1763_v43  ;;  %v1133_v37 = vld [vmem:[%s2428_s25 + $0x18] sm:$0xff]  ;;  %s2688_s25 = scalar_lea.vmem [#allocation8], %s2393_s15 }
 0x2fe   : > { %vm923_vm9 = vmor %vm921_vm8, %vm922_vm7  ;;  %1153 = vmatpush.msra.mxu1 %v1133_v37 }
 0x2ff   : > { %v918_v45 = vsub.f32 1.0, %v917_v44 }
 0x300   : > { %1154 = vmatpush.msra.mxu1 %v1132_v38 }
 0x301   : > { %v919_v47 = vmul.f32 %v1763_v43, %v918_v45 }
 0x302   : > { %1155 = vmatpush.msra.mxu1 %v1131_v39 }
 0x303   : > { %v920_v49 = vadd.f32 %v1763_v43, %v919_v47  ;;  %v1749_v47 = vld [vmem:[%s747_s6] ss:$0 sm:$0xff]  ;;  %s2686_s6 = scalar_lea.vmem [#allocation5], %s2393_s15 }
 0x304   : > { %1156 = vmatpush.msra.mxu1 %v1130_v40 }
 0x305   : > { %v924_v51 = vsel %vm923_vm9, %v1763_v43, %v920_v49 }
 0x306   : > { %v929_v52 = vsel %vm926_vm10, %v928_v50, %v924_v51  ;;  %vm1245_vm10 = vcmask 523264  }
 0x307   : > { %v930_v53 = vmul.f32 %v1759_v26, %v929_v52  ;;  %v2108_v52 = vmov 32.0  }
 0x308   : > { %v958_v54 = vpop.permute.xlu0 %957 }
 0x309   : > { %1588 = vmatmul.msk.f32.vlgmr.msrb.gmra.mxu2 %vm804_vm2, %v930_v53  ;;  %1590 = vmatmul.msk.f32.vlgmr.msrb.gmra.mxu1 %vm804_vm2, %v958_v54 }
 0x311   : > { %1593 = vmatmul.msk.f32.vlgmr.msra.gmra.mxu2 %vm804_vm2, %v1036_v55 }
 0x37e   : > { %v2487_v56 = vpop.f32.mrf.mxu2 }
 0x386   : > { %v982_v57 = vpop.f32.mrf.mxu1 }
 0x387   : > { %v985_v58 = vsel %vm804_vm2, %v982_v57, -inf }
 0x388   : > { %986 = vmax.xlane.f32.xlu2 %v985_v58 }
 0x38c   : > { %v954_v59 = vpop.f32.mrf.mxu2 }
 0x394   : > { %v1060_v60 = vpop.f32.mrf.mxu2 }
 0x395   : > { %v1063_v61 = vsel %vm804_vm2, %v1060_v60, -inf }
 0x396   : > { %1064 = vmax.xlane.f32.xlu1 %v1063_v61 }
 0x3af   : > { %1087 = vrot.lane.b32.xlu1 %v2461_v8, %s2103_s27 }
 0x3fb   : > { %v987_v62 = vpop.xlane.xlu2 %986 }
 0x3fc   : > { %v988_v63 = vsub.f32 %v982_v57, %v987_v62 }
 0x3fe   : > { %v989_v0 = vmul.f32 1.442695, %v988_v63  ;;  %v1204_v63 = vld [vmem:[%s2437_s29 + $0x18] sm:$0xff] }
 0x400   : > { %1764 = vpow2.f32 %v989_v0  ;;  %v1203_v0 = vld [vmem:[%s2437_s29 + $0x10] sm:$0xff] }
 0x406   : > { %v1765_v1 = vpop.eup %1764 }
 0x407   : > { %v991_v2 = vsel %vm804_vm2, %v1765_v1, 0.0 }
 0x408   : > { %992 = vadd.xlane.f32.xlu0 %v991_v2  ;;  %v1201_v2 = vld [vmem:[%s2437_s29] sm:$0xff] }
 0x409   : > { %v1065_v3 = vpop.xlane.xlu1 %1064 }
 0x40a   : > { %v1066_v4 = vsub.f32 %v1060_v60, %v1065_v3  ;;  %v1240_v3 = vld [vmem:[%s2447_s1 + $0x38] sm:$0xff] }
 0x40b   : > { %1257 = vmatpush.msrb.mxu0 %v1240_v3 }
 0x40c   : > { %v1067_v6 = vmul.f32 1.442695, %v1066_v4  ;;  %v1239_v4 = vld [vmem:[%s2447_s1 + $0x30] sm:$0xff] }
 0x40d   : > { %1258 = vmatpush.msrb.mxu0 %v1239_v4 }
 0x40e   : > { %1766 = vpow2.f32 %v1067_v6  ;;  %v1238_v6 = vld [vmem:[%s2447_s1 + $0x28] sm:$0xff] }
 0x40f   : > { %1259 = vmatpush.msrb.mxu0 %v1238_v6 }
 0x414   : > { %v1767_v7 = vpop.eup %1766 }
 0x415   : > { %v1069_v9 = vsel %vm804_vm2, %v1767_v7, 0.0 }
 0x416   : > { %1070 = vadd.xlane.f32.xlu2 %v1069_v9 }
 0x41c   : > { %1114 = vrot.lane.b32.xlu0 %v954_v59, %s2104_s7  ;;  %s1304_s7 = scalar_lea.sflag [#allocation4], %s2379_s3 }
 0x421   : > { %v1088_v10 = vpop.permute.xlu1 %1087 }
 0x422   : > { %1108 = vmatpush.msrb.mxu2 %v1088_v10  ;;  %v1237_v10 = vld [vmem:[%s2447_s1 + $0x20] sm:$0xff] }
 0x423   : > { %1260 = vmatpush.msrb.mxu0 %v1237_v10 }
 0x42e   : > { %1009 = vrot.lane.b32.xlu2 %v2461_v8, %s2105_s9 }
 0x47b   : > { %v993_v11 = vpop.xlane.xlu0 %992 }
 0x47c   : > { %1768 = vrcp.f32 %v993_v11  ;;  %v1005_v16 = vand.u32 2147483648, %v993_v11  ;;  %vm999_vm12 = vweird.f32 %v993_v11  ;;  %v1003_v18 = vand.u32 2147483647, %v993_v11 }
 0x47e   : > { %v1006_v21 = vor.u32 1.1754944e-38, %v1005_v16  ;;  %vm1004_vm14 = vcmp.eq.f32.partialorder %v1003_v18, 8.507059e+37 }
 0x482   : > { %v1769_v12 = vpop.eup %1768 }
 0x483   : > { %v995_v13 = vmul.f32 %v1769_v12, %v993_v11  ;;  %vm1000_vm11 = vweird.f32 %v1769_v12 }
 0x484   : > { %vm1001_vm13 = vmor %vm999_vm12, %vm1000_vm11 }
 0x485   : > { %v996_v14 = vsub.f32 1.0, %v995_v13 }
 0x487   : > { %v997_v15 = vmul.f32 %v1769_v12, %v996_v14 }
 0x489   : > { %v998_v17 = vadd.f32 %v1769_v12, %v997_v15  ;;  %v1071_v19 = vpop.xlane.xlu2 %1070 }
 0x48a   : > { %1770 = vrcp.f32 %v1071_v19  ;;  %v1083_v27 = vand.u32 2147483648, %v1071_v19  ;;  %v1081_v29 = vand.u32 2147483647, %v1071_v19  ;;  %vm1077_vm0 = vweird.f32 %v1071_v19 }
 0x48b   : > { %v1002_v20 = vsel %vm1001_vm13, %v1769_v12, %v998_v17  ;;  %1772 = vrcp.f32 %v2108_v52  ;;  %v1236_v12 = vld [vmem:[%s2447_s1 + $0x18] sm:$0xff] }
 0x48c   : > { %v1007_v22 = vsel %vm1004_vm14, %v1006_v21, %v1002_v20  ;;  %v1084_v31 = vor.u32 1.1754944e-38, %v1083_v27  ;;  %vm1082_vm4 = vcmp.eq.f32.partialorder %v1081_v29, 8.507059e+37  ;;  %1261 = vmatpush.msrb.mxu0 %v1236_v12  ;;  %v1752_v27 = vld [vmem:[%s2688_s25] ss:$0 sm:$0xff] }
 0x48d   : > { %v1008_v25 = vmul.f32 %v1765_v1, %v1007_v22  ;;  %v1202_v1 = vld [vmem:[%s2437_s29 + $0x8] sm:$0xff]  ;;  %s2687_s29 = scalar_lea.vmem [#allocation7], %s2393_s15  ;;  %s1978_s15 = scalar_lea.hbm %s2692_s0, 16 }
 0x48e   : > { %v1115_v41 = vpop.permute.xlu0 %1114  ;;  %v1751_v22 = vld [vmem:[%s2687_s29] ss:$0 sm:$0xff] }
 0x48f   : > { %v1125_v43 = vsel %vm804_vm2, %v2487_v56, %v1115_v41 }
 0x490   : > { %v1771_v23 = vpop.eup %1770 }
 0x491   : > { %v1073_v8 = vmul.f32 %v1771_v23, %v1071_v19  ;;  %v1010_v24 = vpop.permute.xlu2 %1009  ;;  %vm1078_vm15 = vweird.f32 %v1771_v23  ;;  %v1773_v53 = vpop.eup %1772  ;;  %v1750_v19 = vld [vmem:[%s2686_s6] ss:$0 sm:$0xff] }
 0x492   : > { %1030 = vmatpush.msrb.mxu3 %v1010_v24  ;;  %vm1079_vm3 = vmor %vm1077_vm0, %vm1078_vm15  ;;  %v1168_v54 = vmul.f32 32.0, %v1773_v53  ;;  %v1235_v24 = vld [vmem:[%s2447_s1 + $0x10] sm:$0xff] }
 0x493   : > { %v1074_v26 = vsub.f32 1.0, %v1073_v8  ;;  %1591 = vmatmul.msk.f32.vlgmr.msrb.gmra.mxu3 %vm804_vm2, %v1008_v25  ;;  %1262 = vmatpush.msrb.mxu0 %v1235_v24  ;;  %v1234_v25 = vld [vmem:[%s2447_s1 + $0x8] sm:$0xff] }
 0x494   : > { %v1169_v55 = vsub.f32 1.0, %v1168_v54  ;;  %1224 = vmatpush.msra.mxu3 %v1204_v63 }
 0x495   : > { %v1075_v28 = vmul.f32 %v1771_v23, %v1074_v26  ;;  %1263 = vmatpush.msrb.mxu0 %v1234_v25  ;;  %v1233_v26 = vld [vmem:[%s2447_s1] sm:$0xff]  ;;  %s1599_s1 = sshll.u32 %s2690_s13, 3 }
 0x496   : > { %v1170_v56 = vmul.f32 %v1773_v53, %v1169_v55  ;;  %1225 = vmatpush.msra.mxu3 %v1203_v0  ;;  %s1314_s24 = scalar_lea.hbm %s2692_s0, %s1599_s1 }
 0x497   : > { %v1076_v30 = vadd.f32 %v1771_v23, %v1075_v28  ;;  %1264 = vmatpush.msrb.mxu0 %v1233_v26  ;;  %s1318_s27 = sshll.u32 %s1314_s24, 4  ;;  %s1319_s27 = int_to_ptr.hbm [resolvable:$true] %s1318_s27 }
 0x498   : > { %v1171_v57 = vadd.f32 %v1773_v53, %v1170_v56  ;;  %1226 = vmatpush.msra.mxu3 %v1202_v1  ;;  %s1972_s30 = sshra.s32 %s1319_s27, 4  ;;  %s1973_s30 = int_to_ptr.hbm [resolvable:$true] %s1972_s30 }
 0x499   : > { %v1080_v32 = vsel %vm1079_vm3, %v1771_v23, %v1076_v30  ;;  %p1979_p3 = scmp.lt.s32.totalorder %s1973_s30, %s2692_s0 }
 0x49a   : > { %v1085_v33 = vsel %vm1082_vm4, %v1084_v31, %v1080_v32  ;;  %1227 = vmatpush.msra.mxu3 %v1201_v2  ;;  %v1753_v31 = vld [vmem:[%s2689_s19] ss:$0 sm:$0xff] }
 0x49b   : > { %v1086_v34 = vmul.f32 %v1767_v7, %v1085_v33 }
 0x49d   : > { %1594 = vmatmul.msk.f32.vlgmr.msrb.gmra.mxu2 %vm804_vm2, %v1086_v34  ;;  %vm1172_vm2 = vweird.f32 %v1773_v53 }
 0x49e   : > { %v2511_v58 = vsel %vm1172_vm2, %v1773_v53, %v1171_v57  ;;  %v1755_v53 = vld [vmem:[%s2693_s4] ss:$0 sm:$0xff] }
 0x516   : > { %v1032_v35 = vpop.f32.mrf.mxu3 }
 0x517   : > { %1118 = vrot.lane.b32.xlu2 %v1032_v35, %s2106_s20 }
 0x520   : > { %v1110_v36 = vpop.f32.mrf.mxu2 }
 0x521   : > { %1122 = vrot.lane.b32.xlu0 %v1110_v36, %s2107_s11 }
 0x571   : > { %v1119_v42 = vpop.permute.xlu2 %1118 }
 0x572   : > { %v1127_v44 = vsel %vm1126_vm5, %v1125_v43, %v1119_v42 }
 0x593   : > { %v1123_v45 = vpop.permute.xlu0 %1122 }
 0x594   : > { %v1129_v46 = vsel %vm1128_vm6, %v1127_v44, %v1123_v45 }
 0x595   : > { %1595 = vmatmul.msk.f32.vlgmr.msra.gmra.mxu1 %vm777_vm1, %v1129_v46 }
 0x612   : > { %v1158_v48 = vpop.f32.mrf.mxu1 }
 0x613   : > { %v1159_v49 = vadd.f32 %v1749_v47, %v1158_v48 }
 0x615   : > { %v1161_v50 = vadd.f32 %v1159_v49, %v2457_v5 }
 0x617   : > { %v1164_v51 = vsel %vm777_vm1, %v1161_v50, 0.0 }
 0x618   : > { %1165 = vadd.xlane.f32.xlu1 %v1164_v51 }
 0x68b   : > { %v1166_v5 = vpop.xlane.xlu1 %1165 }
 0x68c   : > { %v1174_v59 = vmul.f32 %v2511_v58, %v1166_v5 }
 0x68e   : > { %v1175_v60 = vsub.f32 %v1161_v50, %v1174_v59  ;;  %v1754_v50 = vld [vmem:[%s760_s21] ss:$0 sm:$0xff]  ;;  %s1974_s21 = scalar_lea.hbm %s1973_s30, 8 }
 0x68f   : > { %p1975_p10 = scmp.ne.s32.totalorder %s1973_s30, %s1974_s21  ;;  %p1980_p0 = scmp.lt.s32.totalorder %s1978_s15, %s1974_s21 }
 0x690   : > { %v1176_v61 = vmul.f32 %v1175_v60, %v1175_v60 }
 0x691   : > { %p1976_p11 = pnand %p1975_p10, %p2332_p12  ;;  %p1981_p5 = por %p1980_p0, %p1979_p3 }
 0x692   : > { %v1177_v62 = vsel %vm777_vm1, %v1176_v61, 0.0 }
 0x693   : > { %1178 = vadd.xlane.f32.xlu2 %v1177_v62  ;;  %p1977_p1 = pneg %p1976_p11 }
 0x695   : > { %p1982_p6 = pnand %p1981_p5, %p1977_p1 }
 0x706   : > { %v1179_v7 = vpop.xlane.xlu2 %1178 }
 0x707   : > { %v1180_v9 = vmul.f32 %v1179_v7, %v2511_v58 }
 0x709   : > { %v1181_v11 = vadd.f32 1e-06, %v1180_v9 }
 0x70b   : > { %1774 = vrsqrt.f32 %v1181_v11  ;;  %vm1188_vm8 = vweird.f32 %v1181_v11 }
 0x711   : > { %v1775_v13 = vpop.eup %1774 }
 0x712   : > { %v1183_v14 = vmul.f32 %v1775_v13, %v1181_v11  ;;  %vm1189_vm7 = vweird.f32 %v1775_v13 }
 0x713   : > { %vm1190_vm9 = vmor %vm1188_vm8, %vm1189_vm7 }
 0x714   : > { %v1184_v15 = vmul.f32 %v1775_v13, %v1183_v14 }
 0x716   : > { %v1185_v16 = vmul.f32 0.5, %v1184_v15 }
 0x718   : > { %v1186_v17 = vsub.f32 1.5, %v1185_v16 }
 0x71a   : > { %v1187_v18 = vmul.f32 %v1775_v13, %v1186_v17 }
 0x71c   : > { %v1191_v20 = vsel %vm1190_vm9, %v1775_v13, %v1187_v18 }
 0x71d   : > { %v1192_v21 = vmul.f32 %v1191_v20, %v1175_v60 }
 0x71f   : > { %v1196_v23 = vmul.f32 %v1750_v19, %v1192_v21 }
 0x721   : > { %v1200_v8 = vadd.f32 %v1751_v22, %v1196_v23 }
 0x723   : > { %1596 = vmatmul.msk.f32.vlgmr.msra.gmra.mxu3 %vm777_vm1, %v1200_v8 }
 0x7a6   : > { %v1229_v28 = vpop.f32.mrf.mxu3 }
 0x7a7   : > { %v1230_v29 = vadd.f32 %v1752_v27, %v1229_v28 }
 0x7a9   : > { %v1232_v30 = vmax.f32 %v1230_v29, 0.0 }
 0x7ab   : > { %1597 = vmatmul.msk.f32.vlgmr.msrb.gmra.mxu0 %vm1245_vm10, %v1232_v30 }
 0x828   : > { %v1266_v32 = vpop.f32.mrf.mxu0 }
 0x829   : > { %v1267_v33 = vadd.f32 %v1753_v31, %v1266_v32 }
 0x82b   : > { %v1269_v34 = vadd.f32 %v1267_v33, %v1200_v8 }
 0x82d   : > { %v1272_v35 = vsel %vm777_vm1, %v1269_v34, 0.0 }
 0x82e   : > { %1273 = vadd.xlane.f32.xlu0 %v1272_v35 }
 0x8a1   : > { %v1274_v36 = vpop.xlane.xlu0 %1273 }
 0x8a2   : > { %v1275_v37 = vmul.f32 %v1274_v36, %v2511_v58 }
 0x8a4   : > { %v1276_v38 = vsub.f32 %v1269_v34, %v1275_v37 }
 0x8a6   : > { %v1277_v39 = vmul.f32 %v1276_v38, %v1276_v38 }
 0x8a8   : > { %v1278_v40 = vsel %vm777_vm1, %v1277_v39, 0.0 }
 0x8a9   : > { %1279 = vadd.xlane.f32.xlu1 %v1278_v40 }
 0x91c   : > { %v1280_v41 = vpop.xlane.xlu1 %1279 }
 0x91d   : > { %v1281_v42 = vmul.f32 %v1280_v41, %v2511_v58 }
 0x91f   : > { %v1282_v43 = vadd.f32 1e-06, %v1281_v42 }
 0x921   : > { %1776 = vrsqrt.f32 %v1282_v43  ;;  %vm1289_vm12 = vweird.f32 %v1282_v43 }
 0x927   : > { %v1777_v44 = vpop.eup %1776 }
 0x928   : > { %v1284_v45 = vmul.f32 %v1777_v44, %v1282_v43  ;;  %vm1290_vm11 = vweird.f32 %v1777_v44 }
 0x929   : > { %vm1291_vm13 = vmor %vm1289_vm12, %vm1290_vm11 }
 0x92a   : > { %v1285_v46 = vmul.f32 %v1777_v44, %v1284_v45 }
 0x92c   : > { %v1286_v47 = vmul.f32 0.5, %v1285_v46 }
 0x92e   : > { %v1287_v48 = vsub.f32 1.5, %v1286_v47 }
 0x930   : > { %v1288_v49 = vmul.f32 %v1777_v44, %v1287_v48 }
 0x932   : > { %v1292_v51 = vsel %vm1291_vm13, %v1777_v44, %v1288_v49 }
 0x933   : > { %v1293_v52 = vmul.f32 %v1292_v51, %v1276_v38 }
 0x935   : > { %v1297_v54 = vmul.f32 %v1754_v50, %v1293_v52 }
 0x937   : > { %v1301_v55 = vadd.f32 %v1755_v53, %v1297_v54 }
 0x939   : > { %1302 = vst.msk [vmem:[%s2451_s23] sm:$0xff] %vm777_vm1, %v1301_v55 }
 0x93a   : > { %1985 = shalt.err (!%p1982_p6)
}
 0x93b   : > { %1618 = dma.vmem_to_hbm [thread:$0]  (%p2332_p12), %s1317_s17, 128, %s1319_s27, %s1304_s7  }
 0x93c PF: > { %p1644_p8 = scmp.ge.s32.totalorder %s2092_s18, 2  ;;  %s1330_s23 = sand.u32 1, %s2064_s28  }
 0x93d   : > { %s1331_s22 = scalar_lea.sflag [#allocation4], %s1330_s23 }
 0x93e   : > { %p1640_p9 = pnand %p1644_p8, %p2341_p13 }
 0x940   : > { %p1641_p2 = pneg %p1640_p9 }
 0x942   : > { %2047 = dma.done.wait (%p1641_p2), %s1331_s22, 128  }
 0x943   : > { %2049 = vsyncadd (%p1641_p2), %s1331_s22, 4294967168  ;;  %s38_s18 = sadd.s32 1, %s2092_s18   ;;  %s2695_s25 = sld [smem:[#allocation19_spill]] }
 0x944   : > { %p35_p4 = scmp.ge.s32.totalorder %s38_s18, 6   ;;  %s2696_s26 = sld [smem:[#allocation20_spill]] }
 0x945   : > { %s2697_s27 = sld [smem:[#allocation30_spill]] }
 0x946   : > { %s2698_s28 = sld [smem:[#allocation21_spill]] }
 0x947   : > { %s2699_s29 = sld [smem:[#allocation22_spill]] }
 0x948   : > { %s2700_s30 = sld [smem:[#allocation31_spill]]  ;;  %37 = sbr.rel (!%p35_p4) target bundleno = 30 (0x1e), region = 203 }
 0x949   : > { %s2701_s14 = sld [smem:[#allocation25_spill]] }
 0x94a   : > { %s2702_s15 = sld [smem:[#allocation26_spill]] }
 0x94b   : > { %s2703_s16 = sld [smem:[#allocation27_spill]] }
 0x94c   : > { %s2704_s17 = sld [smem:[#allocation28_spill]] }
 0x94d   :  { %1337 = vsyncpa [#allocation3], 1 }
 0x94e   :  { %1339 = vsyncpa [#allocation3 + $0x1], 1 }
 0x94f   :  { %1340 = vsyncpa [#allocation6], 1 }
 0x950   :  { %1342 = vsyncpa [#allocation6 + $0x1], 1 }
 0x951   :  { %1343 = vsyncpa [#allocation9], 1 }
 0x952   :  { %1345 = vsyncpa [#allocation9 + $0x1], 1 }
 0x953   :  { %1346 = vsyncpa [#allocation12], 1 }
 0x954   :  { %1348 = vsyncpa [#allocation12 + $0x1], 1 }
 0x955   :  { %1349 = vsyncpa [#allocation4], 1 }
 0x956   :  { %1351 = vsyncpa [#allocation4 + $0x1], 1 }

</bundles_post_ra>
